<compile_context>
chip_gen: v5e
topology: v5e:2x2
jax: 0.10.0
libtpu: 0.0.40
codegen_flags: <defaults>
</compile_context>

<pallas_src>
import functools

import jax
import jax.numpy as jnp
from jax.experimental import pallas as pl
from jax.experimental.pallas import tpu as pltpu


def se_kernel(x_ref, w1t_ref, w2t_ref, o_ref, *, inv_hw, native_mul):
    # x_ref block: (TB, C, HW); w1t: (C, C//r); w2t: (C//r, C)

    # Squeeze: f32-accumulated global average pool.  No persistent f32 copy of
    # the block is materialized; the cast fuses per-vreg into the reduce.
    pooled = jnp.sum(x_ref[...], axis=-1, dtype=jnp.float32) * inv_hw    # (TB, C)

    # Excite: Linear -> ReLU -> Linear -> Sigmoid, batched across TB.  These
    # matmuls are tiny and off the HBM-bound critical path; pooled keeps C on
    # the lane axis so no relayout is needed before the dot.
    h = jnp.dot(pooled, w1t_ref[...],
                preferred_element_type=jnp.float32)                      # (TB, C//r)
    h = jnp.maximum(h, 0.0)
    s = jnp.dot(h, w2t_ref[...],
                preferred_element_type=jnp.float32)                      # (TB, C)
    s = 1.0 / (1.0 + jnp.exp(-s))        # exact sigmoid (EUP exp + exact divide)

    # Scale: second, independent streaming read of x_ref -> o_ref.  When the
    # last batch block is partial (B % TB != 0) the padded rows of pooled/s may
    # hold garbage (even inf/NaN); harmless — their stores are masked by
    # Pallas.  Do not "fix" this by re-adding wrapper-side padding copies.
    if native_mul:
        # f32 inputs, or bf16 on parts with a bf16 VPU (v6e/v7x): multiply in
        # the storage dtype — 1 vmul + 1 vst per packed vreg on the store path.
        scale = s.astype(o_ref.dtype)[:, :, None]                        # (TB, C, 1)
        o_ref[...] = x_ref[...].astype(o_ref.dtype) * scale
    else:
        # v5e-class parts (no bf16 VPU/EUP): keep the multiply in f32.
        scale = s[:, :, None]
        o_ref[...] = (x_ref[...].astype(jnp.float32) * scale).astype(o_ref.dtype)


def _chip_info():
    """Return (vmem_capacity_bytes, is_multi_tensorcore, has_bf16_vpu)."""
    vmem_cap = 128 << 20
    kind = ""
    try:
        kind = jax.devices()[0].device_kind.lower()
    except Exception:
        pass
    is_v7 = "v7" in kind
    try:
        vmem_cap = int(getattr(pltpu.get_tpu_info(), "vmem_capacity_bytes", vmem_cap))
    except Exception:
        if is_v7:
            vmem_cap = 64 << 20
    # v5e and older have no bf16 VPU/EUP; v6e/v7x do.
    has_bf16_vpu = not any(t in kind for t in ("v2", "v3", "v4", "v5"))
    return vmem_cap, is_v7, has_bf16_vpu


def se_block_pallas(x, w1, w2):
    """x: (B, C, H, W); w1: (C//r, C); w2: (C, C//r). Returns (B, C, H, W)."""
    B, C, H, W = x.shape
    HW = H * W
    x_flat = x.reshape(B, C, HW)          # metadata-only reshape, no HBM copy

    vmem_cap, is_multicore, has_bf16_vpu = _chip_info()

    # Live VMEM ~= 2 input bufs + 2 output bufs = 4x block bytes (no f32 temp).
    headroom = 20 << 20 if vmem_cap <= (64 << 20) else 28 << 20
    vmem_limit = max(32 << 20, min(100 << 20, vmem_cap - headroom))
    block_budget = max(1 << 20, (vmem_limit - (8 << 20)) // 4)

    elem = jnp.dtype(x.dtype).itemsize
    per_batch_bytes = C * HW * elem
    TB = max(1, min(B, block_budget // max(1, per_batch_bytes)))
    # TODO(synk): HW-tiled two-phase fallback (grid over HW with a channel-sum
    # accumulator) for feature maps where even a (1, C, HW) block overflows
    # VMEM; the single fused pass stays the default since it is bytes-optimal.

    if is_multicore and B >= 2 and B * per_batch_bytes >= (4 << 20):
        # 2-TensorCore parts (v7x): keep >=2 parallel grid steps once the
        # workload is big enough to amortize the ~0.35 us per-step overhead.
        TB = min(TB, (B + 1) // 2)

    # If a single TB==1 block still exceeds the budget, grow the limit rather
    # than fail to compile (keeping headroom below physical VMEM).
    needed = 4 * TB * per_batch_bytes + (8 << 20)
    if needed > vmem_limit:
        vmem_limit = min(vmem_cap - (8 << 20), needed)

    num_blocks = pl.cdiv(B, TB)

    # Pre-transpose weights so the excite matmuls are row-major lane-dense.
    w1t = w1.T  # (C, C//r)
    w2t = w2.T  # (C//r, C)

    native_mul = (x.dtype == jnp.float32) or (x.dtype == jnp.bfloat16 and has_bf16_vpu)
    kernel = functools.partial(se_kernel, inv_hw=1.0 / float(HW), native_mul=native_mul)

    # TODO(synk): on v7x, sweep pltpu.CORE_PARALLEL on the batch axis for
    # explicit cross-TensorCore sharding; plain "parallel" is the portable
    # default kept here.
    out_flat = pl.pallas_call(
        kernel,
        out_shape=jax.ShapeDtypeStruct((B, C, HW), x.dtype),
        grid_spec=pltpu.PrefetchScalarGridSpec(
            num_scalar_prefetch=0,
            grid=(num_blocks,),
            in_specs=[
                pl.BlockSpec((TB, C, HW), lambda b: (b, 0, 0)),
                pl.BlockSpec(memory_space=pltpu.MemorySpace.VMEM),  # w1t, whole-array resident
                pl.BlockSpec(memory_space=pltpu.MemorySpace.VMEM),  # w2t, whole-array resident
            ],
            out_specs=pl.BlockSpec((TB, C, HW), lambda b: (b, 0, 0)),
        ),
        compiler_params=pltpu.CompilerParams(
            dimension_semantics=("parallel",),
            vmem_limit_bytes=int(vmem_limit),
        ),
    )(x_flat, w1t, w2t)

    return out_flat.reshape(B, C, H, W)


def se_block_ref(x, w1, w2):
    """Pure-JAX reference matching the PyTorch forward."""
    y = jnp.mean(x, axis=(2, 3))                  # (B, C)
    y = jnp.maximum(y @ w1.T, 0.0)                # (B, C//r)
    y = jax.nn.sigmoid(y @ w2.T)                  # (B, C)
    return x * y[:, :, None, None]


if __name__ == "__main__":
    # Module constructed as se_block(channel=64, ratio=16) -> operates on C=32.
    B, C, H, W = 2, 32, 16, 16
    ratio = 16
    hidden = C // ratio  # 2

    key = jax.random.PRNGKey(0)
    kx, k1, k2, kx2 = jax.random.split(key, 4)

    x = jax.random.normal(kx, (B, C, H, W), dtype=jnp.float32)
    # PyTorch nn.Linear default init: U(-1/sqrt(fan_in), 1/sqrt(fan_in))
    b1 = 1.0 / jnp.sqrt(jnp.float32(C))
    b2 = 1.0 / jnp.sqrt(jnp.float32(hidden))
    w1 = jax.random.uniform(k1, (hidden, C), jnp.float32, -b1, b1)  # fc1 weight
    w2 = jax.random.uniform(k2, (C, hidden), jnp.float32, -b2, b2)  # fc2 weight

    out = se_block_pallas(x, w1, w2)
    out = jax.block_until_ready(out)
    ref = se_block_ref(x, w1, w2)
    assert out.shape == (B, C, H, W)
    assert jnp.allclose(out, ref, atol=1e-5, rtol=1e-5)

    # Second check: odd, non-128-aligned spatial size (exercises the no-padding
    # path with masked vst inside the kernel instead of wrapper pad copies).
    B2, H2, W2 = 3, 7, 9
    x2 = jax.random.normal(kx2, (B2, C, H2, W2), dtype=jnp.float32)
    out2 = jax.block_until_ready(se_block_pallas(x2, w1, w2))
    ref2 = se_block_ref(x2, w1, w2)
    assert jnp.allclose(out2, ref2, atol=1e-5, rtol=1e-5)

    print("KERNEL_OK")
</pallas_src>

<mosaic_0001>
module attributes {stable_mosaic.version = 11 : i64} {
  func.func @se_kernel(%arg0: i32, %arg1: memref<2x32x256xf32, #tpu.memory_space<vmem>>, %arg2: memref<32x2xf32, #tpu.memory_space<vmem>>, %arg3: memref<2x32xf32, #tpu.memory_space<vmem>>, %arg4: memref<2x32x256xf32, #tpu.memory_space<vmem>>) attributes {dimension_semantics = [#tpu.dimension_semantics<parallel>], iteration_bounds = array<i64: 1>, scalar_prefetch = 0 : i64, scratch_operands = 0 : i64, tpu.core_type = #tpu.core_type<tc>, window_params = [{transform_indices = @transform_0, window_bounds = array<i64: 2, 32, 256>}, {pipeline_mode = #tpu.pipeline_mode<synchronous>, transform_indices = @transform_1, window_bounds = array<i64: 32, 2>}, {pipeline_mode = #tpu.pipeline_mode<synchronous>, transform_indices = @transform_2, window_bounds = array<i64: 2, 32>}, {transform_indices = @transform_3, window_bounds = array<i64: 2, 32, 256>}]} {
    %c0 = arith.constant 0 : index
    %c0_0 = arith.constant 0 : index
    %c0_1 = arith.constant 0 : index
    %0 = vector.load %arg1[%c0, %c0_0, %c0_1] : memref<2x32x256xf32, #tpu.memory_space<vmem>>, vector<2x32x256xf32>
    %cst = arith.constant dense<0.000000e+00> : vector<2x32xf32>
    %1 = vector.multi_reduction <add>, %0, %cst [2] : vector<2x32x256xf32> to vector<2x32xf32>
    %cst_2 = arith.constant 3.906250e-03 : f32
    %2 = vector.broadcast %cst_2 : f32 to vector<2x32xf32>
    %3 = arith.mulf %1, %2 : vector<2x32xf32>
    %c0_3 = arith.constant 0 : index
    %c0_4 = arith.constant 0 : index
    %4 = vector.load %arg2[%c0_3, %c0_4] : memref<32x2xf32, #tpu.memory_space<vmem>>, vector<32x2xf32>
    %cst_5 = arith.constant dense<0.000000e+00> : vector<2x2xf32>
    %5 = tpu.matmul %3, %4, %cst_5 {dimension_numbers = #tpu.dot_dimension_numbers<[1], [0], [0], [1], [0, 0, 1, 1], [], []>} : vector<2x32xf32>, vector<32x2xf32>, vector<2x2xf32> -> vector<2x2xf32>
    %cst_6 = arith.constant 0.000000e+00 : f32
    %6 = vector.broadcast %cst_6 : f32 to vector<2x2xf32>
    %7 = arith.maximumf %5, %6 : vector<2x2xf32>
    %c0_7 = arith.constant 0 : index
    %c0_8 = arith.constant 0 : index
    %8 = vector.load %arg3[%c0_7, %c0_8] : memref<2x32xf32, #tpu.memory_space<vmem>>, vector<2x32xf32>
    %cst_9 = arith.constant dense<0.000000e+00> : vector<2x32xf32>
    %9 = tpu.matmul %7, %8, %cst_9 {dimension_numbers = #tpu.dot_dimension_numbers<[1], [0], [0], [1], [0, 0, 1, 1], [], []>} : vector<2x2xf32>, vector<2x32xf32>, vector<2x32xf32> -> vector<2x32xf32>
    %cst_10 = arith.constant 0.000000e+00 : f32
    %10 = vector.broadcast %cst_10 : f32 to vector<2x32xf32>
    %11 = arith.subf %10, %9 : vector<2x32xf32>
    %12 = math.exp %11 : vector<2x32xf32>
    %cst_11 = arith.constant 1.000000e+00 : f32
    %13 = vector.broadcast %cst_11 : f32 to vector<2x32xf32>
    %14 = arith.addf %13, %12 : vector<2x32xf32>
    %cst_12 = arith.constant 1.000000e+00 : f32
    %15 = vector.broadcast %cst_12 : f32 to vector<2x32xf32>
    %16 = arith.divf %15, %14 : vector<2x32xf32>
    %17 = vector.shape_cast %16 : vector<2x32xf32> to vector<2x32x1xf32>
    %c0_13 = arith.constant 0 : index
    %c0_14 = arith.constant 0 : index
    %c0_15 = arith.constant 0 : index
    %18 = vector.load %arg1[%c0_13, %c0_14, %c0_15] : memref<2x32x256xf32, #tpu.memory_space<vmem>>, vector<2x32x256xf32>
    %19 = vector.broadcast %17 : vector<2x32x1xf32> to vector<2x32x256xf32>
    %20 = arith.mulf %18, %19 : vector<2x32x256xf32>
    %c0_16 = arith.constant 0 : index
    %c0_17 = arith.constant 0 : index
    %c0_18 = arith.constant 0 : index
    %21 = vector.load %arg4[%c0_16, %c0_17, %c0_18] : memref<2x32x256xf32, #tpu.memory_space<vmem>>, vector<2x32x256xf32>
    tpu.vector_store %arg4[%c0_16, %c0_17, %c0_18], %20 {strides = array<i32>} : memref<2x32x256xf32, #tpu.memory_space<vmem>>, vector<2x32x256xf32>,
    return
  }
  func.func @transform_0(%arg0: i32) -> (i32, i32, i32) {
    %c0_i32 = arith.constant 0 : i32
    %c0_i32_0 = arith.constant 0 : i32
    %c0_i32_1 = arith.constant 0 : i32
    return %arg0, %c0_i32, %c0_i32_0 : i32, i32, i32
  }
  func.func @transform_1(%arg0: i32) -> (i32, i32) {
    %c0_i32 = arith.constant 0 : i32
    %c0_i32_0 = arith.constant 0 : i32
    %c0_i32_1 = arith.constant 0 : i32
    return %c0_i32, %c0_i32_0 : i32, i32
  }
  func.func @transform_2(%arg0: i32) -> (i32, i32) {
    %c0_i32 = arith.constant 0 : i32
    %c0_i32_0 = arith.constant 0 : i32
    %c0_i32_1 = arith.constant 0 : i32
    return %c0_i32, %c0_i32_0 : i32, i32
  }
  func.func @transform_3(%arg0: i32) -> (i32, i32, i32) {
    %c0_i32 = arith.constant 0 : i32
    %c0_i32_0 = arith.constant 0 : i32
    %c0_i32_1 = arith.constant 0 : i32
    return %arg0, %c0_i32, %c0_i32_0 : i32, i32, i32
  }
}

</mosaic_0001>

<bundles_post_ra>
// kernel: tpu_custom_call.1
= control target key start
LH: loop header
LB: loop body
LE: loop exit
PB: predicated region body
PF: predicated region fallthrough
CT: control target
= control target key end

     0   :  { %8 = vsyncpa [#allocation3], 0  ;;  %s475_s0 = inlined_call_operand.hbm [shape: f32[2,32,256], index: 0, kind: input, shape index: {}]   ;;  %s476_s1 = inlined_call_operand.vmem [shape: f32[32,2], index: 1, kind: input, shape index: {}]   ;;  %s477_s2 = inlined_call_operand.vmem [shape: f32[2,32], index: 2, kind: input, shape index: {}]   ;;  %s478_s3 = inlined_call_operand.hbm [shape: f32[2,32,256], index: 3, kind: output, shape index: {}]  }
   0x1   :  { %9 = vsyncpa [#allocation4], 0  ;;  %s14_s14 = sshll.u32 %s475_s0, 4  ;;  %s360_s15 = smov [#allocation2]   ;;  %s15_s14 = int_to_ptr.hbm [resolvable:$true] %s14_s14 }
   0x2   :  { %s16_s16 = sshll.u32 %s360_s15, 4  ;;  %s361_s17 = smov 256   ;;  %s17_s16 = int_to_ptr.vmem [resolvable:$true] %s16_s16 }
   0x3   :  { %s362_s18 = smov 16  }
   0x4   :  { %22 = dma.hbm_to_vmem [thread:$0]  %s15_s14, 2048, %s17_s16, [#allocation3], %s361_s17, %s361_s17, %s362_s18  }
   0x5   :  { %356 = dma.done.wait [#allocation3], 2048  }
   0x6   :  { %357 = vsyncadd [#allocation3], 4294965248  ;;  %v390_v0 = vld [vmem:[#allocation2 + $0x40] sm:$0xff]  ;;  %v392_v1 = vld [vmem:[#allocation2 + $0x48] sm:$0xff]  ;;  %v91_v31 = vlaneseq  ;;  %vm96_vm0 = vcmask 130112   ;;  %vm100_vm1 = vcmask 195712  }
   0x7   :  { %v394_v2 = vld [vmem:[#allocation2] sm:$0xff]  ;;  %v59_v3 = vadd.f32 %v392_v1, %v390_v0  ;;  %v398_v4 = vld [vmem:[#allocation2 + $0x8] sm:$0xff]  ;;  %v408_v9 = vld [vmem:[#allocation2 + $0x50] sm:$0xff]  ;;  %vm104_vm2 = vcmask 261312   ;;  %vm113_vm3 = vcmask 1041409   ;;  %vm115_vm4 = vcmask 261120  }
   0x8   :  { %v400_v5 = vld [vmem:[#allocation2 + $0x20] sm:$0xff]  ;;  %v402_v6 = vld [vmem:[#allocation2 + $0x28] sm:$0xff]  ;;  %v47_v7 = vadd.f32 %v398_v4, %v394_v2  ;;  %v410_v10 = vld [vmem:[#allocation2 + $0x58] sm:$0xff]  ;;  %v92_v32 = vand.u32 127, %v91_v31  ;;  %vm144_vm5 = vcmask 1041408   ;;  %vm140_vm6 = vcmask 15360  }
   0x9   :  { %v53_v8 = vadd.f32 %v402_v6, %v400_v5  ;;  %60 = vadd.xlane.f32.xlu1 %v59_v3  ;;  %v412_v11 = vld [vmem:[#allocation2 + $0x10] sm:$0xff]  ;;  %v414_v12 = vld [vmem:[#allocation2 + $0x18] sm:$0xff]  ;;  %v416_v13 = vld [vmem:[#allocation2 + $0x60] sm:$0xff]  ;;  %v62_v15 = vadd.f32 %v410_v10, %v408_v9  ;;  %s275_s30 = sshll.u32 %s478_s3, 4  ;;  %s276_s30 = int_to_ptr.hbm [resolvable:$true] %s275_s30 }
   0xa   :  { %48 = vadd.xlane.f32.xlu0 %v47_v7  ;;  %v418_v14 = vld [vmem:[#allocation2 + $0x68] sm:$0xff]  ;;  %v50_v16 = vadd.f32 %v414_v12, %v412_v11  ;;  %v426_v18 = vld [vmem:[#allocation2 + $0x70] sm:$0xff]  ;;  %v428_v19 = vld [vmem:[#allocation2 + $0x78] sm:$0xff]  ;;  %v94_v34 = vadd.s32 4294967288, %v92_v32  ;;  %v98_v43 = vadd.s32 4294967280, %v92_v32  ;;  %v102_v47 = vadd.s32 4294967272, %v92_v32 }
   0xb   :  { %54 = vadd.xlane.f32.xlu2 %v53_v8  ;;  %v65_v17 = vadd.f32 %v418_v14, %v416_v13  ;;  %v430_v20 = vld [vmem:[#allocation2 + $0x30] sm:$0xff]  ;;  %v432_v21 = vld [vmem:[#allocation2 + $0x38] sm:$0xff]  ;;  %v68_v22 = vadd.f32 %v428_v19, %v426_v18  ;;  %v80_v26 = vld [vmem:[%s476_s1 + $0x8] sm:$0xff] }
   0xc   :  { %v56_v23 = vadd.f32 %v432_v21, %v430_v20  ;;  %v82_v24 = vld [vmem:[%s476_s1 + $0x18] sm:$0xff]  ;;  %v81_v25 = vld [vmem:[%s476_s1 + $0x10] sm:$0xff]  ;;  %v79_v27 = vld [vmem:[%s476_s1] sm:$0xff] }
   0xd   :  { %130 = vmatpush.msra.mxu0 %v82_v24  ;;  %v139_v3 = vld [vmem:[%s477_s2] sm:$0x3]  ;;  %s363_s2 = smov [#allocation5]  }
   0xe   :  { %289 = vmatpush.msk.msra.mxu1 %vm144_vm5, %v139_v3  ;;  %s273_s27 = sshll.u32 %s363_s2, 4  ;;  %s274_s27 = int_to_ptr.vmem [resolvable:$true] %s273_s27 }
   0xf   :  { %131 = vmatpush.msra.mxu0 %v81_v25 }
  0x11   :  { %63 = vadd.xlane.f32.xlu1 %v62_v15  ;;  %132 = vmatpush.msra.mxu0 %v80_v26  ;;  %v189_v15 = vshrl.u32 %v91_v31, 7 }
  0x12   :  { %51 = vadd.xlane.f32.xlu0 %v50_v16 }
  0x13   :  { %66 = vadd.xlane.f32.xlu2 %v65_v17  ;;  %133 = vmatpush.msra.mxu0 %v79_v27  ;;  %v202_v16 = vadd.s32 16, %v189_v15  ;;  %v196_v17 = vadd.s32 8, %v189_v15 }
  0x14   :  { %295 = vset.pattern.permute.xlu2 %v189_v15 }
  0x15   :  { %297 = vset.pattern.permute.xlu1 %v202_v16  ;;  %296 = vset.pattern.permute.xlu0 %v196_v17 }
  0x19   :  { %69 = vadd.xlane.f32.xlu1 %v68_v22 }
  0x1a   :  { %57 = vadd.xlane.f32.xlu0 %v56_v23 }
  0x7c   :  { %v61_v28 = vpop.xlane.xlu1 %60 }
  0x7d   :  { %v49_v29 = vpop.xlane.xlu0 %48  ;;  %v75_v39 = vmul.f32 0.00390625, %v61_v28 }
  0x7e   :  { %v55_v30 = vpop.xlane.xlu2 %54  ;;  %v71_v40 = vmul.f32 0.00390625, %v49_v29 }
  0x7f   :  { %v106_v45 = vperm.slane %v75_v39, %v92_v32  ;;  %v73_v46 = vmul.f32 0.00390625, %v55_v30 }
  0x80   :  { %v93_v48 = vperm.slane %v71_v40, %v92_v32 }
  0x81   :  { %v99_v56 = vperm.slane %v73_v46, %v98_v43 }
  0x84   :  { %v64_v33 = vpop.xlane.xlu1 %63 }
  0x85   :  { %v76_v35 = vmul.f32 0.00390625, %v64_v33  ;;  %v52_v36 = vpop.xlane.xlu0 %51 }
  0x86   :  { %v67_v37 = vpop.xlane.xlu2 %66  ;;  %v72_v38 = vmul.f32 0.00390625, %v52_v36 }
  0x87   :  { %v77_v41 = vmul.f32 0.00390625, %v67_v37  ;;  %v107_v42 = vperm.slane %v76_v35, %v94_v34 }
  0x88   :  { %v95_v44 = vperm.slane %v72_v38, %v94_v34  ;;  %v208_v38 = vadd.s32 24, %v189_v15 }
  0x89   :  { %v109_v49 = vperm.slane %v77_v41, %v98_v43  ;;  %v108_v51 = vsel %vm96_vm0, %v107_v42, %v106_v45 }
  0x8a   :  { %v97_v54 = vsel %vm96_vm0, %v95_v44, %v93_v48 }
  0x8b   :  { %v110_v59 = vsel %vm100_vm1, %v109_v49, %v108_v51  ;;  %v101_v60 = vsel %vm100_vm1, %v99_v56, %v97_v54 }
  0x8c   :  { %v70_v50 = vpop.xlane.xlu1 %69 }
  0x8d   :  { %v78_v52 = vmul.f32 0.00390625, %v70_v50  ;;  %v58_v53 = vpop.xlane.xlu0 %57 }
  0x8e   :  { %v74_v55 = vmul.f32 0.00390625, %v58_v53 }
  0x8f   :  { %v111_v57 = vperm.slane %v78_v52, %v102_v47 }
  0x90   :  { %v103_v58 = vperm.slane %v74_v55, %v102_v47 }
  0x91   :  { %v112_v61 = vsel %vm104_vm2, %v111_v57, %v110_v59 }
  0x92   :  { %v105_v62 = vsel %vm104_vm2, %v103_v58, %v101_v60 }
  0x93   :  { %v114_v63 = vsel %vm113_vm3, %v112_v61, %v105_v62 }
  0x94   :  { %288 = vmatmul.msk.f32.vlgmr.msra.gmra.mxu0 %vm115_vm4, %v114_v63 }
 0x111   :  { %v135_v7 = vpop.f32.mrf.mxu0 }
 0x112   :  { %v138_v8 = vmax.f32 %v135_v7, 0.0 }
 0x114   :  { %290 = vmatmul.msk.f32.vlgmr.msra.gmra.mxu1 %vm140_vm6, %v138_v8 }
 0x191   :  { %v165_v22 = vpop.f32.mrf.mxu1 }
 0x192   :  { %v168_v23 = vsub.f32 0.0, %v165_v22 }
 0x194   :  { %v169_v24 = vmul.f32 1.442695, %v168_v23 }
 0x196   :  { %304 = vpow2.f32 %v169_v24 }
 0x19c   :  { %v305_v25 = vpop.eup %304 }
 0x19d   :  { %v171_v26 = vadd.f32 1.0, %v305_v25 }
 0x19f   :  { %306 = vrcp.f32 %v171_v26  ;;  %v183_v30 = vand.u32 2147483648, %v171_v26  ;;  %v181_v33 = vand.u32 2147483647, %v171_v26  ;;  %vm177_vm8 = vweird.f32 %v171_v26 }
 0x1a1   :  { %v184_v34 = vor.u32 1.1754944e-38, %v183_v30  ;;  %vm182_vm10 = vcmp.eq.f32.partialorder %v181_v33, 8.507059e+37 }
 0x1a5   :  { %v307_v27 = vpop.eup %306 }
 0x1a6   :  { %v173_v28 = vmul.f32 %v307_v27, %v171_v26  ;;  %vm178_vm7 = vweird.f32 %v307_v27 }
 0x1a7   :  { %vm179_vm9 = vmor %vm177_vm8, %vm178_vm7 }
 0x1a8   :  { %v174_v29 = vsub.f32 1.0, %v173_v28 }
 0x1aa   :  { %v175_v32 = vmul.f32 %v307_v27, %v174_v29 }
 0x1ac   :  { %v176_v31 = vadd.f32 %v307_v27, %v175_v32 }
 0x1ae   :  { %v180_v35 = vsel %vm179_vm9, %v307_v27, %v176_v31 }
 0x1af   :  { %v185_v36 = vsel %vm182_vm10, %v184_v34, %v180_v35 }
 0x1b0   :  { %v187_v37 = vperm.slane %v185_v36, 0  ;;  %v212_v39 = vperm.slane %v185_v36, 1 }
 0x1b2   :  { %204 = vperm.xlu1 %297, %v187_v37   ;;  %198 = vperm.xlu0 %296, %v187_v37  }
 0x1b3   :  { %192 = vperm.xlu2 %295, %v187_v37  }
 0x1ba   :  { %300 = vset.pattern.permute.xlu1 %v196_v17  ;;  %303 = vset.pattern.permute.xlu0 %v208_v38 }
 0x1bb   :  { %298 = vset.pattern.permute.xlu2 %v208_v38 }
 0x1c2   :  { %223 = vperm.xlu1 %300, %v212_v39  }
 0x1c3   :  { %210 = vperm.xlu2 %298, %v187_v37  }
 0x1ca   :  { %302 = vset.pattern.permute.xlu1 %v208_v38 }
 0x1cb   :  { %299 = vset.pattern.permute.xlu2 %v189_v15 }
 0x1d2   :  { %235 = vperm.xlu1 %302, %v212_v39  }
 0x1d3   :  { %217 = vperm.xlu2 %299, %v212_v39  }
 0x1db   :  { %301 = vset.pattern.permute.xlu2 %v202_v16 }
 0x1e3   :  { %229 = vperm.xlu2 %301, %v212_v39  }
 0x20d   :  { %v193_v40 = vpop.permute.xlu2 %192 }
 0x20e   :  { %v237_v41 = vmul.f32 %v193_v40, %v394_v2  ;;  %v238_v42 = vmul.f32 %v193_v40, %v398_v4 }
 0x210   :  { %253 = vst [vmem:[#allocation5] sm:$0xff] %v237_v41 }
 0x211   :  { %254 = vst [vmem:[#allocation5 + $0x8] sm:$0xff] %v238_v42 }
 0x21d   :  { %v211_v43 = vpop.permute.xlu2 %210 }
 0x21e   :  { %v243_v44 = vmul.f32 %v211_v43, %v430_v20  ;;  %v244_v45 = vmul.f32 %v211_v43, %v432_v21 }
 0x220   :  { %259 = vst [vmem:[#allocation5 + $0x30] sm:$0xff] %v243_v44 }
 0x221   :  { %260 = vst [vmem:[#allocation5 + $0x38] sm:$0xff] %v244_v45 }
 0x224   :  { %v205_v46 = vpop.permute.xlu1 %204  ;;  %v199_v47 = vpop.permute.xlu0 %198 }
 0x225   :  { %v241_v48 = vmul.f32 %v205_v46, %v400_v5  ;;  %v242_v49 = vmul.f32 %v205_v46, %v402_v6  ;;  %v239_v50 = vmul.f32 %v199_v47, %v412_v11  ;;  %v240_v2 = vmul.f32 %v199_v47, %v414_v12 }
 0x227   :  { %257 = vst [vmem:[#allocation5 + $0x20] sm:$0xff] %v241_v48 }
 0x228   :  { %258 = vst [vmem:[#allocation5 + $0x28] sm:$0xff] %v242_v49 }
 0x229   :  { %255 = vst [vmem:[#allocation5 + $0x10] sm:$0xff] %v239_v50 }
 0x22a   :  { %256 = vst [vmem:[#allocation5 + $0x18] sm:$0xff] %v240_v2 }
 0x22d   :  { %v218_v4 = vpop.permute.xlu2 %217 }
 0x22e   :  { %v245_v20 = vmul.f32 %v218_v4, %v390_v0  ;;  %v246_v21 = vmul.f32 %v218_v4, %v392_v1 }
 0x230   :  { %261 = vst [vmem:[#allocation5 + $0x40] sm:$0xff] %v245_v20 }
 0x231   :  { %262 = vst [vmem:[#allocation5 + $0x48] sm:$0xff] %v246_v21 }
 0x234   :  { %v224_v51 = vpop.permute.xlu1 %223 }
 0x235   :  { %v247_v5 = vmul.f32 %v224_v51, %v408_v9  ;;  %v248_v6 = vmul.f32 %v224_v51, %v410_v10 }
 0x237   :  { %263 = vst [vmem:[#allocation5 + $0x50] sm:$0xff] %v247_v5 }
 0x238   :  { %264 = vst [vmem:[#allocation5 + $0x58] sm:$0xff] %v248_v6 }
 0x23d   :  { %v230_v11 = vpop.permute.xlu2 %229 }
 0x23e   :  { %v249_v12 = vmul.f32 %v230_v11, %v416_v13  ;;  %v250_v52 = vmul.f32 %v230_v11, %v418_v14 }
 0x240   :  { %265 = vst [vmem:[#allocation5 + $0x60] sm:$0xff] %v249_v12 }
 0x241   :  { %266 = vst [vmem:[#allocation5 + $0x68] sm:$0xff] %v250_v52 }
 0x244   :  { %v236_v0 = vpop.permute.xlu1 %235 }
 0x245   :  { %v251_v1 = vmul.f32 %v236_v0, %v426_v18  ;;  %v252_v9 = vmul.f32 %v236_v0, %v428_v19 }
 0x247   :  { %267 = vst [vmem:[#allocation5 + $0x70] sm:$0xff] %v251_v1 }
 0x248   :  { %268 = vst [vmem:[#allocation5 + $0x78] sm:$0xff] %v252_v9 }
 0x249   :  { %281 = dma.vmem_to_hbm [thread:$0]  %s274_s27, 2048, %s276_s30, [#allocation4], %s361_s17, %s361_s17, %s362_s18  }
 0x24a   :  { %358 = dma.done.wait [#allocation4], 2048  }
 0x24b   :  { %359 = vsyncadd [#allocation4], 4294965248 }
 0x24c   :  { %286 = vsyncpa [#allocation3], 1 }
 0x24d   :  { %287 = vsyncpa [#allocation4], 1 }

</bundles_post_ra>
